<compile_context>
chip_gen: v7x
topology: tpu7x:2x2x1
jax: 0.10.0
libtpu: 0.0.40
codegen_flags: <defaults>
</compile_context>

<pallas_src>
import numpy as np
import jax
import jax.numpy as jnp
from jax.experimental import pallas as pl
from jax.experimental.pallas import tpu as pltpu

K = 5              # conv kernel size
PAD = 2            # same-padding
EPS = 1e-5         # BatchNorm2d eps
NEG_SLOPE = 0.01   # nn.LeakyReLU default negative_slope
MXU_DTYPE = jnp.bfloat16   # MXU operand dtype; accumulation is always f32
ACT_DTYPE = jnp.bfloat16   # inter-block activation HBM dtype

_COMPILER_PARAMS = pltpu.CompilerParams(
    dimension_semantics=("parallel",),      # pipeline + megacore sharding
    # 32 MiB is safe on every generation (v7x scoped default); per-step buffers
    # at these shapes are < 1 MiB.  Raise on v5e/v6e if B_TILE*H grows large.
    vmem_limit_bytes=32 * 1024 * 1024,
)


# --------------------------------------------------------------------------
# Kernels
# --------------------------------------------------------------------------
def _conv_lrelu_stats(x_ref, scale_ref, shift_ref, w_ref, act_ref, stats_ref, im_ref):
    """B_TILE images: (prev BN affine) -> 5x5 conv -> LeakyReLU -> partial BN stats.

    x_ref     (B, H, W*Cin)      input rows, channel-fastest lanes (f32 or bf16)
    scale_ref (1, W*Cin) or None previous block's BN scale (tiled over W, f32)
    shift_ref (1, W*Cin) or None previous block's BN shift
    w_ref     (K*W*Cin, W*Cout)  block-Toeplitz conv weights (bf16); horizontal
                                 zero-padding is baked into this matrix.
    act_ref   (B, H, W*Cout)     pre-BN activation out (bf16)
    stats_ref (1, 2, W*Cout)     per-step [sum; sum-of-squares] partials (f32)
    im_ref    (B, H, K*W*Cin)    bf16 im2row scratch
    """
    b_tile, h_rows, w_cin = x_ref.shape
    w_cout = act_ref.shape[2]

    # Previous block's BatchNorm folded into the load (skipped for block 1).
    if scale_ref is not None:
        x = x_ref[...].astype(jnp.float32) * scale_ref[...] + shift_ref[...]
        x = x.astype(MXU_DTYPE)
    else:
        x = x_ref[...].astype(MXU_DTYPE)                      # (B, H, W*Cin)

    # im2row assembly: band kh holds the input rows shifted by kh-PAD.  Only the
    # missing top/bottom rows of each band are zeroed (these are the vertical
    # conv padding); horizontal padding lives in the Toeplitz weight structure.
    for kh in range(K):                                       # static, unrolled
        d = kh - PAD
        r0 = max(0, -d)
        r1 = min(h_rows, h_rows - d)
        col = kh * w_cin
        if r0 > 0:
            im_ref[:, :r0, col:col + w_cin] = jnp.zeros(
                (b_tile, r0, w_cin), MXU_DTYPE)
        if r1 < h_rows:
            im_ref[:, r1:, col:col + w_cin] = jnp.zeros(
                (b_tile, h_rows - r1, w_cin), MXU_DTYPE)
        im_ref[:, r0:r1, col:col + w_cin] = x[:, r0 + d:r1 + d, :]

    # Whole receptive field for all B_TILE*H output rows in ONE matmul.
    im = im_ref[...].reshape(b_tile * h_rows, K * w_cin)      # bf16
    acc = jnp.dot(im, w_ref[...], preferred_element_type=jnp.float32)

    act = jnp.maximum(acc, NEG_SLOPE * acc)                   # LeakyReLU (f32)
    act_ref[...] = act.reshape(b_tile, h_rows, w_cout).astype(act_ref.dtype)

    # Partial BatchNorm statistics for this step (exact two-phase BN: the
    # W-fold and cross-step reduction happen on tiny vectors in the wrapper).
    s1 = jnp.sum(act, axis=0, keepdims=True)                  # (1, W*Cout)
    s2 = jnp.sum(act * act, axis=0, keepdims=True)            # (1, W*Cout)
    stats_ref[0] = jnp.concatenate([s1, s2], axis=0)          # (2, W*Cout)


def _make_conv_kernel(apply_affine):
    if apply_affine:
        def kernel(x_ref, scale_ref, shift_ref, w_ref, act_ref, stats_ref, im_ref):
            _conv_lrelu_stats(x_ref, scale_ref, shift_ref, w_ref,
                              act_ref, stats_ref, im_ref)
    else:
        def kernel(x_ref, w_ref, act_ref, stats_ref, im_ref):
            _conv_lrelu_stats(x_ref, None, None, w_ref,
                              act_ref, stats_ref, im_ref)
    return kernel


def bn_affine_kernel(act_ref, scale_ref, shift_ref, o_ref):
    """Finalize the last block: y = act * scale + shift (lane-dense store)."""
    o_ref[...] = act_ref[...].astype(jnp.float32) * scale_ref[...] + shift_ref[...]


# --------------------------------------------------------------------------
# Wrappers
# --------------------------------------------------------------------------
def _pick_batch_tile(n, h, target_rows=256):
    """Largest divisor of n with b*h <= target_rows (fills the MXU M dim)."""
    best = 1
    for b in range(1, n + 1):
        if n % b == 0 and b * h <= target_rows:
            best = b
    return best


def _toeplitz_weights(w_hwio, width):
    """(K,K,Cin,Cout) conv weights -> (K*W*Cin, W*Cout) block-Toeplitz matrix.

    T[(kh, wx, ci), (w, co)] = w[kh, wx - w + PAD, ci, co] if 0 <= wx-w+PAD < K
    else 0.  The horizontal zero-padding is implicit (rows only cover the real
    W input columns), so the im2row buffer needs no pad columns and the data of
    each kh band lands at column 0 of that band.
    """
    kk, _, cin, cout = w_hwio.shape
    sel = np.zeros((kk, width, width), np.float32)   # sel[kw, wx, w]
    for kw in range(kk):
        for w in range(width):
            wx = w + kw - PAD
            if 0 <= wx < width:
                sel[kw, wx, w] = 1.0
    t = jnp.einsum('kxw,hkio->hxiwo', jnp.asarray(sel), w_hwio)
    return t.reshape(kk * width * cin, width * cout).astype(MXU_DTYPE)


def _fold_stats(stats, gamma, beta, count):
    """(steps, 2, W*C) partial sums -> hoisted BN (scale, shift) vectors (C,)."""
    channels = gamma.shape[0]
    s = jnp.sum(stats, axis=0).reshape(2, -1, channels).sum(axis=1)   # (2, C)
    mean = s[0] / count
    var = s[1] / count - mean * mean            # biased variance (training BN)
    scale = gamma * jax.lax.rsqrt(var + EPS)
    shift = beta - mean * scale
    return scale, shift


def _tile_lanes(v, width):
    """Pre-broadcast a per-channel vector to the (1, W*C) lane layout."""
    return jnp.tile(v, width)[None, :].astype(jnp.float32)


def _conv_block_call(x3d, t_w, scale_t=None, shift_t=None, *, b_tile):
    """Run one conv->LeakyReLU block; optional previous-BN affine fused into the load."""
    n, h, w_cin = x3d.shape
    k_w_cin, w_cout = t_w.shape
    steps = n // b_tile

    in_specs = [pl.BlockSpec((b_tile, h, w_cin), lambda i: (i, 0, 0))]
    args = [x3d]
    if scale_t is not None:
        in_specs += [pl.BlockSpec((1, w_cin), lambda i: (0, 0)),
                     pl.BlockSpec((1, w_cin), lambda i: (0, 0))]
        args += [scale_t, shift_t]
    in_specs.append(pl.BlockSpec((k_w_cin, w_cout), lambda i: (0, 0)))  # resident weights
    args.append(t_w)

    act, stats = pl.pallas_call(
        _make_conv_kernel(scale_t is not None),
        grid=(steps,),
        in_specs=in_specs,
        out_specs=[
            pl.BlockSpec((b_tile, h, w_cout), lambda i: (i, 0, 0)),
            pl.BlockSpec((1, 2, w_cout), lambda i: (i, 0, 0)),
        ],
        out_shape=[
            jax.ShapeDtypeStruct((n, h, w_cout), ACT_DTYPE),
            jax.ShapeDtypeStruct((steps, 2, w_cout), jnp.float32),
        ],
        scratch_shapes=[pltpu.VMEM((b_tile, h, k_w_cin), MXU_DTYPE)],  # im2row
        compiler_params=_COMPILER_PARAMS,
    )(*args)
    return act, stats


def _bn_affine_call(act, scale_t, shift_t, b_tile):
    n, h, wc = act.shape
    return pl.pallas_call(
        bn_affine_kernel,
        grid=(n // b_tile,),
        in_specs=[
            pl.BlockSpec((b_tile, h, wc), lambda i: (i, 0, 0)),
            pl.BlockSpec((1, wc), lambda i: (0, 0)),
            pl.BlockSpec((1, wc), lambda i: (0, 0)),
        ],
        out_specs=pl.BlockSpec((b_tile, h, wc), lambda i: (i, 0, 0)),
        out_shape=jax.ShapeDtypeStruct((n, h, wc), jnp.float32),
        compiler_params=_COMPILER_PARAMS,
    )(act, scale_t, shift_t)


def double_conv_nhwc(x_nhwc, w1, g1, b1, w2, g2, b2):
    """DoubleConv forward, NHWC in / NHWC out (no layout passes)."""
    n, h, w, cin = x_nhwc.shape
    cout = w2.shape[-1]
    count = n * h * w
    b_tile = _pick_batch_tile(n, h)

    x2d = x_nhwc.reshape(n, h, w * cin)          # free: collapse minor dims
    t1 = _toeplitz_weights(w1, w)
    t2 = _toeplitz_weights(w2, w)

    # Block 1: conv -> LeakyReLU, partial BN stats (no input affine).
    act1, st1 = _conv_block_call(x2d, t1, b_tile=b_tile)
    sc1, sh1 = _fold_stats(st1, g1, b1, count)

    # Block 2: BN1 fused into the load, conv -> LeakyReLU, partial BN stats.
    act2, st2 = _conv_block_call(act1, t2, _tile_lanes(sc1, w), _tile_lanes(sh1, w),
                                 b_tile=b_tile)
    sc2, sh2 = _fold_stats(st2, g2, b2, count)

    # Finalize BN2.
    # TODO(synk): fuse this affine into the next consumer of DoubleConv.
    y2d = _bn_affine_call(act2, _tile_lanes(sc2, w), _tile_lanes(sh2, w), b_tile)
    return y2d.reshape(n, h, w, cout)


@jax.jit
def double_conv(x_nchw, w1, g1, b1, w2, g2, b2):
    """PyTorch-parity entry point: (N, Cin, H, W) -> (N, Cout, H, W)."""
    x = jnp.transpose(x_nchw, (0, 2, 3, 1))      # NCHW -> NHWC (boundary only)
    y = double_conv_nhwc(x, w1, g1, b1, w2, g2, b2)
    return jnp.transpose(y, (0, 3, 1, 2))        # NHWC -> NCHW


# --------------------------------------------------------------------------
# Pure-JAX reference (PyTorch DoubleConv, training-mode BN)
# --------------------------------------------------------------------------
def reference(x_nchw, w1, g1, b1, w2, g2, b2,
              conv_dtype=jnp.float32, inter_dtype=jnp.float32):
    """conv_dtype=bf16 models MXU input rounding (f32 accumulate); inter_dtype=bf16
    models the bf16 HBM round trip of the pre-BN activations (stats stay f32)."""
    def block(x, w, g, b):
        y = jax.lax.conv_general_dilated(
            x.astype(conv_dtype), w.astype(conv_dtype),
            window_strides=(1, 1), padding=((PAD, PAD), (PAD, PAD)),
            dimension_numbers=('NHWC', 'HWIO', 'NHWC'),
            preferred_element_type=jnp.float32)
        y = jnp.maximum(y, NEG_SLOPE * y)
        mean = jnp.mean(y, axis=(0, 1, 2))
        var = jnp.mean((y - mean) ** 2, axis=(0, 1, 2))
        scale = g * jax.lax.rsqrt(var + EPS)
        shift = b - mean * scale
        y_q = y.astype(inter_dtype).astype(jnp.float32)
        return y_q * scale + shift

    x = jnp.transpose(x_nchw, (0, 2, 3, 1))
    h = block(x, w1, g1, b1)
    y = block(h, w2, g2, b2)
    return jnp.transpose(y, (0, 3, 1, 2))


if __name__ == "__main__":
    # Shapes consistent with the module: in_channels=4, mid=out_channels=8,
    # batch=2, spatial 16x16 (W*Cout = 128 -> lane-dense tiles).
    N, CIN, CMID, COUT, H, W = 2, 4, 8, 8, 16, 16

    key = jax.random.PRNGKey(0)
    kx, kw1, kw2 = jax.random.split(key, 3)
    x = jax.random.normal(kx, (N, CIN, H, W), dtype=jnp.float32)
    # Synthetic conv weights in HWIO; BN affine params at PyTorch init (1, 0).
    w1 = 0.1 * jax.random.normal(kw1, (K, K, CIN, CMID), dtype=jnp.float32)
    w2 = 0.1 * jax.random.normal(kw2, (K, K, CMID, COUT), dtype=jnp.float32)
    g1 = jnp.ones((CMID,), jnp.float32)
    b1 = jnp.zeros((CMID,), jnp.float32)
    g2 = jnp.ones((COUT,), jnp.float32)
    b2 = jnp.zeros((COUT,), jnp.float32)

    out = jax.block_until_ready(double_conv(x, w1, g1, b1, w2, g2, b2))

    # 1) Kernel-math check: same bf16 MXU operands / f32 accumulate / bf16
    #    inter-block activations as the Pallas path.
    ref_bf16 = jax.block_until_ready(
        reference(x, w1, g1, b1, w2, g2, b2,
                  conv_dtype=jnp.bfloat16, inter_dtype=jnp.bfloat16))
    np.testing.assert_allclose(np.asarray(out), np.asarray(ref_bf16),
                               rtol=3e-3, atol=3e-3)

    # 2) Semantic check against the exact f32 PyTorch forward; the only gaps are
    #    bf16 rounding of MXU operands and of the intermediate activations.
    ref_f32 = jax.block_until_ready(
        reference(x, w1, g1, b1, w2, g2, b2,
                  conv_dtype=jnp.float32, inter_dtype=jnp.float32))
    np.testing.assert_allclose(np.asarray(out), np.asarray(ref_f32),
                               rtol=5e-2, atol=5e-2)

    print("KERNEL_OK")
</pallas_src>

<mosaic_0001>
module attributes {stable_mosaic.version = 11 : i64} {
  func.func @kernel(%arg0: i32, %arg1: memref<2x16x64xf32, #tpu.memory_space<vmem>>, %arg2: memref<320x128xbf16, #tpu.memory_space<vmem>>, %arg3: memref<2x16x128xbf16, #tpu.memory_space<vmem>>, %arg4: memref<1x2x128xf32, #tpu.memory_space<vmem>>, %arg5: memref<2x16x320xbf16, #tpu.memory_space<vmem>>) attributes {dimension_semantics = [#tpu.dimension_semantics<parallel>], iteration_bounds = array<i64: 1>, scalar_prefetch = 0 : i64, scratch_operands = 1 : i64, tpu.core_type = #tpu.core_type<tc>, window_params = [{transform_indices = @transform_0, window_bounds = array<i64: 2, 16, 64>}, {pipeline_mode = #tpu.pipeline_mode<synchronous>, transform_indices = @transform_1, window_bounds = array<i64: 320, 128>}, {transform_indices = @transform_2, window_bounds = array<i64: 2, 16, 128>}, {transform_indices = @transform_3, window_bounds = array<i64: 1, 2, 128>}]} {
    %c0 = arith.constant 0 : index
    %c0_0 = arith.constant 0 : index
    %c0_1 = arith.constant 0 : index
    %0 = vector.load %arg1[%c0, %c0_0, %c0_1] : memref<2x16x64xf32, #tpu.memory_space<vmem>>, vector<2x16x64xf32>
    %1 = arith.truncf %0 : vector<2x16x64xf32> to vector<2x16x64xbf16>
    %cst = arith.constant 0.000000e+00 : bf16
    %2 = vector.broadcast %cst : bf16 to vector<2x2x64xbf16>
    %c0_2 = arith.constant 0 : index
    %c0_3 = arith.constant 0 : index
    %c0_4 = arith.constant 0 : index
    %3 = vector.load %arg5[%c0_2, %c0_3, %c0_4] : memref<2x16x320xbf16, #tpu.memory_space<vmem>>, vector<2x2x64xbf16>
    tpu.vector_store %arg5[%c0_2, %c0_3, %c0_4], %2 {strides = array<i32>} : memref<2x16x320xbf16, #tpu.memory_space<vmem>>, vector<2x2x64xbf16>,
    %4 = vector.extract_strided_slice %1 {offsets = [0, 0, 0], sizes = [2, 14, 64], strides = [1, 1, 1]} : vector<2x16x64xbf16> to vector<2x14x64xbf16>
    %c0_5 = arith.constant 0 : index
    %c2 = arith.constant 2 : index
    %c0_6 = arith.constant 0 : index
    %5 = vector.load %arg5[%c0_5, %c2, %c0_6] : memref<2x16x320xbf16, #tpu.memory_space<vmem>>, vector<2x14x64xbf16>
    tpu.vector_store %arg5[%c0_5, %c2, %c0_6], %4 {strides = array<i32>} : memref<2x16x320xbf16, #tpu.memory_space<vmem>>, vector<2x14x64xbf16>,
    %cst_7 = arith.constant 0.000000e+00 : bf16
    %6 = vector.broadcast %cst_7 : bf16 to vector<2x1x64xbf16>
    %c0_8 = arith.constant 0 : index
    %c0_9 = arith.constant 0 : index
    %c64 = arith.constant 64 : index
    %7 = vector.load %arg5[%c0_8, %c0_9, %c64] : memref<2x16x320xbf16, #tpu.memory_space<vmem>>, vector<2x1x64xbf16>
    tpu.vector_store %arg5[%c0_8, %c0_9, %c64], %6 {strides = array<i32>} : memref<2x16x320xbf16, #tpu.memory_space<vmem>>, vector<2x1x64xbf16>,
    %8 = vector.extract_strided_slice %1 {offsets = [0, 0, 0], sizes = [2, 15, 64], strides = [1, 1, 1]} : vector<2x16x64xbf16> to vector<2x15x64xbf16>
    %c0_10 = arith.constant 0 : index
    %c1 = arith.constant 1 : index
    %c64_11 = arith.constant 64 : index
    %9 = vector.load %arg5[%c0_10, %c1, %c64_11] : memref<2x16x320xbf16, #tpu.memory_space<vmem>>, vector<2x15x64xbf16>
    tpu.vector_store %arg5[%c0_10, %c1, %c64_11], %8 {strides = array<i32>} : memref<2x16x320xbf16, #tpu.memory_space<vmem>>, vector<2x15x64xbf16>,
    %c0_12 = arith.constant 0 : index
    %c0_13 = arith.constant 0 : index
    %c128 = arith.constant 128 : index
    %10 = vector.load %arg5[%c0_12, %c0_13, %c128] : memref<2x16x320xbf16, #tpu.memory_space<vmem>>, vector<2x16x64xbf16>
    tpu.vector_store %arg5[%c0_12, %c0_13, %c128], %1 {strides = array<i32>} : memref<2x16x320xbf16, #tpu.memory_space<vmem>>, vector<2x16x64xbf16>,
    %cst_14 = arith.constant 0.000000e+00 : bf16
    %11 = vector.broadcast %cst_14 : bf16 to vector<2x1x64xbf16>
    %c0_15 = arith.constant 0 : index
    %c15 = arith.constant 15 : index
    %c192 = arith.constant 192 : index
    %12 = vector.load %arg5[%c0_15, %c15, %c192] : memref<2x16x320xbf16, #tpu.memory_space<vmem>>, vector<2x1x64xbf16>
    tpu.vector_store %arg5[%c0_15, %c15, %c192], %11 {strides = array<i32>} : memref<2x16x320xbf16, #tpu.memory_space<vmem>>, vector<2x1x64xbf16>,
    %13 = vector.extract_strided_slice %1 {offsets = [0, 1, 0], sizes = [2, 15, 64], strides = [1, 1, 1]} : vector<2x16x64xbf16> to vector<2x15x64xbf16>
    %c0_16 = arith.constant 0 : index
    %c0_17 = arith.constant 0 : index
    %c192_18 = arith.constant 192 : index
    %14 = vector.load %arg5[%c0_16, %c0_17, %c192_18] : memref<2x16x320xbf16, #tpu.memory_space<vmem>>, vector<2x15x64xbf16>
    tpu.vector_store %arg5[%c0_16, %c0_17, %c192_18], %13 {strides = array<i32>} : memref<2x16x320xbf16, #tpu.memory_space<vmem>>, vector<2x15x64xbf16>,
    %cst_19 = arith.constant 0.000000e+00 : bf16
    %15 = vector.broadcast %cst_19 : bf16 to vector<2x2x64xbf16>
    %c0_20 = arith.constant 0 : index
    %c14 = arith.constant 14 : index
    %c256 = arith.constant 256 : index
    %16 = vector.load %arg5[%c0_20, %c14, %c256] : memref<2x16x320xbf16, #tpu.memory_space<vmem>>, vector<2x2x64xbf16>
    tpu.vector_store %arg5[%c0_20, %c14, %c256], %15 {strides = array<i32>} : memref<2x16x320xbf16, #tpu.memory_space<vmem>>, vector<2x2x64xbf16>,
    %17 = vector.extract_strided_slice %1 {offsets = [0, 2, 0], sizes = [2, 14, 64], strides = [1, 1, 1]} : vector<2x16x64xbf16> to vector<2x14x64xbf16>
    %c0_21 = arith.constant 0 : index
    %c0_22 = arith.constant 0 : index
    %c256_23 = arith.constant 256 : index
    %18 = vector.load %arg5[%c0_21, %c0_22, %c256_23] : memref<2x16x320xbf16, #tpu.memory_space<vmem>>, vector<2x14x64xbf16>
    tpu.vector_store %arg5[%c0_21, %c0_22, %c256_23], %17 {strides = array<i32>} : memref<2x16x320xbf16, #tpu.memory_space<vmem>>, vector<2x14x64xbf16>,
    %c0_24 = arith.constant 0 : index
    %c0_25 = arith.constant 0 : index
    %c0_26 = arith.constant 0 : index
    %19 = vector.load %arg5[%c0_24, %c0_25, %c0_26] : memref<2x16x320xbf16, #tpu.memory_space<vmem>>, vector<2x16x320xbf16>
    %20 = vector.shape_cast %19 : vector<2x16x320xbf16> to vector<32x320xbf16>
    %c0_27 = arith.constant 0 : index
    %c0_28 = arith.constant 0 : index
    %21 = vector.load %arg2[%c0_27, %c0_28] : memref<320x128xbf16, #tpu.memory_space<vmem>>, vector<320x128xbf16>
    %cst_29 = arith.constant dense<0.000000e+00> : vector<32x128xf32>
    %22 = tpu.matmul %20, %21, %cst_29 {dimension_numbers = #tpu.dot_dimension_numbers<[1], [0], [0], [1], [0, 0, 1, 1], [], []>} : vector<32x320xbf16>, vector<320x128xbf16>, vector<32x128xf32> -> vector<32x128xf32>
    %cst_30 = arith.constant 0.00999999977 : f32
    %23 = vector.broadcast %cst_30 : f32 to vector<32x128xf32>
    %24 = arith.mulf %23, %22 : vector<32x128xf32>
    %25 = arith.maximumf %22, %24 : vector<32x128xf32>
    %26 = vector.shape_cast %25 : vector<32x128xf32> to vector<2x16x128xf32>
    %27 = arith.truncf %26 : vector<2x16x128xf32> to vector<2x16x128xbf16>
    %c0_31 = arith.constant 0 : index
    %c0_32 = arith.constant 0 : index
    %c0_33 = arith.constant 0 : index
    %28 = vector.load %arg3[%c0_31, %c0_32, %c0_33] : memref<2x16x128xbf16, #tpu.memory_space<vmem>>, vector<2x16x128xbf16>
    tpu.vector_store %arg3[%c0_31, %c0_32, %c0_33], %27 {strides = array<i32>} : memref<2x16x128xbf16, #tpu.memory_space<vmem>>, vector<2x16x128xbf16>,
    %cst_34 = arith.constant dense<0.000000e+00> : vector<128xf32>
    %29 = vector.multi_reduction <add>, %25, %cst_34 [0] : vector<32x128xf32> to vector<128xf32>
    %30 = vector.shape_cast %29 : vector<128xf32> to vector<1x128xf32>
    %31 = arith.mulf %25, %25 : vector<32x128xf32>
    %cst_35 = arith.constant dense<0.000000e+00> : vector<128xf32>
    %32 = vector.multi_reduction <add>, %31, %cst_35 [0] : vector<32x128xf32> to vector<128xf32>
    %33 = vector.shape_cast %32 : vector<128xf32> to vector<1x128xf32>
    %34 = tpu.concatenate %30, %33 in 0 : vector<1x128xf32>, vector<1x128xf32> -> vector<2x128xf32>
    %c0_36 = arith.constant 0 : index
    %c0_37 = arith.constant 0 : index
    %c0_38 = arith.constant 0 : index
    %35 = vector.load %arg4[%c0_36, %c0_37, %c0_38] : memref<1x2x128xf32, #tpu.memory_space<vmem>>, vector<1x2x128xf32>
    %36 = vector.shape_cast %35 : vector<1x2x128xf32> to vector<2x128xf32>
    %37 = vector.shape_cast %34 : vector<2x128xf32> to vector<1x2x128xf32>
    tpu.vector_store %arg4[%c0_36, %c0_37, %c0_38], %37 {strides = array<i32>} : memref<1x2x128xf32, #tpu.memory_space<vmem>>, vector<1x2x128xf32>,
    return
  }
  func.func @transform_0(%arg0: i32) -> (i32, i32, i32) {
    %c0_i32 = arith.constant 0 : i32
    %c0_i32_0 = arith.constant 0 : i32
    %c0_i32_1 = arith.constant 0 : i32
    return %arg0, %c0_i32, %c0_i32_0 : i32, i32, i32
  }
  func.func @transform_1(%arg0: i32) -> (i32, i32) {
    %c0_i32 = arith.constant 0 : i32
    %c0_i32_0 = arith.constant 0 : i32
    %c0_i32_1 = arith.constant 0 : i32
    return %c0_i32, %c0_i32_0 : i32, i32
  }
  func.func @transform_2(%arg0: i32) -> (i32, i32, i32) {
    %c0_i32 = arith.constant 0 : i32
    %c0_i32_0 = arith.constant 0 : i32
    %c0_i32_1 = arith.constant 0 : i32
    return %arg0, %c0_i32, %c0_i32_0 : i32, i32, i32
  }
  func.func @transform_3(%arg0: i32) -> (i32, i32, i32) {
    %c0_i32 = arith.constant 0 : i32
    %c0_i32_0 = arith.constant 0 : i32
    %c0_i32_1 = arith.constant 0 : i32
    return %arg0, %c0_i32, %c0_i32_0 : i32, i32, i32
  }
}

module attributes {stable_mosaic.version = 11 : i64} {
  func.func @kernel(%arg0: i32, %arg1: memref<2x16x128xbf16, #tpu.memory_space<vmem>>, %arg2: memref<1x128xf32, #tpu.memory_space<vmem>>, %arg3: memref<1x128xf32, #tpu.memory_space<vmem>>, %arg4: memref<640x128xbf16, #tpu.memory_space<vmem>>, %arg5: memref<2x16x128xbf16, #tpu.memory_space<vmem>>, %arg6: memref<1x2x128xf32, #tpu.memory_space<vmem>>, %arg7: memref<2x16x640xbf16, #tpu.memory_space<vmem>>) attributes {dimension_semantics = [#tpu.dimension_semantics<parallel>], iteration_bounds = array<i64: 1>, scalar_prefetch = 0 : i64, scratch_operands = 1 : i64, tpu.core_type = #tpu.core_type<tc>, window_params = [{transform_indices = @transform_0, window_bounds = array<i64: 2, 16, 128>}, {pipeline_mode = #tpu.pipeline_mode<synchronous>, transform_indices = @transform_1, window_bounds = array<i64: 1, 128>}, {pipeline_mode = #tpu.pipeline_mode<synchronous>, transform_indices = @transform_2, window_bounds = array<i64: 1, 128>}, {pipeline_mode = #tpu.pipeline_mode<synchronous>, transform_indices = @transform_3, window_bounds = array<i64: 640, 128>}, {transform_indices = @transform_4, window_bounds = array<i64: 2, 16, 128>}, {transform_indices = @transform_5, window_bounds = array<i64: 1, 2, 128>}]} {
    %c0 = arith.constant 0 : index
    %c0_0 = arith.constant 0 : index
    %c0_1 = arith.constant 0 : index
    %0 = vector.load %arg1[%c0, %c0_0, %c0_1] : memref<2x16x128xbf16, #tpu.memory_space<vmem>>, vector<2x16x128xbf16>
    %1 = arith.extf %0 : vector<2x16x128xbf16> to vector<2x16x128xf32>
    %c0_2 = arith.constant 0 : index
    %c0_3 = arith.constant 0 : index
    %2 = vector.load %arg2[%c0_2, %c0_3] : memref<1x128xf32, #tpu.memory_space<vmem>>, vector<1x128xf32>
    %3 = vector.shape_cast %2 : vector<1x128xf32> to vector<1x1x128xf32>
    %4 = vector.broadcast %3 : vector<1x1x128xf32> to vector<2x16x128xf32>
    %5 = arith.mulf %1, %4 : vector<2x16x128xf32>
    %c0_4 = arith.constant 0 : index
    %c0_5 = arith.constant 0 : index
    %6 = vector.load %arg3[%c0_4, %c0_5] : memref<1x128xf32, #tpu.memory_space<vmem>>, vector<1x128xf32>
    %7 = vector.shape_cast %6 : vector<1x128xf32> to vector<1x1x128xf32>
    %8 = vector.broadcast %7 : vector<1x1x128xf32> to vector<2x16x128xf32>
    %9 = arith.addf %5, %8 : vector<2x16x128xf32>
    %10 = arith.truncf %9 : vector<2x16x128xf32> to vector<2x16x128xbf16>
    %cst = arith.constant 0.000000e+00 : bf16
    %11 = vector.broadcast %cst : bf16 to vector<2x2x128xbf16>
    %c0_6 = arith.constant 0 : index
    %c0_7 = arith.constant 0 : index
    %c0_8 = arith.constant 0 : index
    %12 = vector.load %arg7[%c0_6, %c0_7, %c0_8] : memref<2x16x640xbf16, #tpu.memory_space<vmem>>, vector<2x2x128xbf16>
    tpu.vector_store %arg7[%c0_6, %c0_7, %c0_8], %11 {strides = array<i32>} : memref<2x16x640xbf16, #tpu.memory_space<vmem>>, vector<2x2x128xbf16>,
    %13 = vector.extract_strided_slice %10 {offsets = [0, 0, 0], sizes = [2, 14, 128], strides = [1, 1, 1]} : vector<2x16x128xbf16> to vector<2x14x128xbf16>
    %c0_9 = arith.constant 0 : index
    %c2 = arith.constant 2 : index
    %c0_10 = arith.constant 0 : index
    %14 = vector.load %arg7[%c0_9, %c2, %c0_10] : memref<2x16x640xbf16, #tpu.memory_space<vmem>>, vector<2x14x128xbf16>
    tpu.vector_store %arg7[%c0_9, %c2, %c0_10], %13 {strides = array<i32>} : memref<2x16x640xbf16, #tpu.memory_space<vmem>>, vector<2x14x128xbf16>,
    %cst_11 = arith.constant 0.000000e+00 : bf16
    %15 = vector.broadcast %cst_11 : bf16 to vector<2x1x128xbf16>
    %c0_12 = arith.constant 0 : index
    %c0_13 = arith.constant 0 : index
    %c128 = arith.constant 128 : index
    %16 = vector.load %arg7[%c0_12, %c0_13, %c128] : memref<2x16x640xbf16, #tpu.memory_space<vmem>>, vector<2x1x128xbf16>
    tpu.vector_store %arg7[%c0_12, %c0_13, %c128], %15 {strides = array<i32>} : memref<2x16x640xbf16, #tpu.memory_space<vmem>>, vector<2x1x128xbf16>,
    %17 = vector.extract_strided_slice %10 {offsets = [0, 0, 0], sizes = [2, 15, 128], strides = [1, 1, 1]} : vector<2x16x128xbf16> to vector<2x15x128xbf16>
    %c0_14 = arith.constant 0 : index
    %c1 = arith.constant 1 : index
    %c128_15 = arith.constant 128 : index
    %18 = vector.load %arg7[%c0_14, %c1, %c128_15] : memref<2x16x640xbf16, #tpu.memory_space<vmem>>, vector<2x15x128xbf16>
    tpu.vector_store %arg7[%c0_14, %c1, %c128_15], %17 {strides = array<i32>} : memref<2x16x640xbf16, #tpu.memory_space<vmem>>, vector<2x15x128xbf16>,
    %c0_16 = arith.constant 0 : index
    %c0_17 = arith.constant 0 : index
    %c256 = arith.constant 256 : index
    %19 = vector.load %arg7[%c0_16, %c0_17, %c256] : memref<2x16x640xbf16, #tpu.memory_space<vmem>>, vector<2x16x128xbf16>
    tpu.vector_store %arg7[%c0_16, %c0_17, %c256], %10 {strides = array<i32>} : memref<2x16x640xbf16, #tpu.memory_space<vmem>>, vector<2x16x128xbf16>,
    %cst_18 = arith.constant 0.000000e+00 : bf16
    %20 = vector.broadcast %cst_18 : bf16 to vector<2x1x128xbf16>
    %c0_19 = arith.constant 0 : index
    %c15 = arith.constant 15 : index
    %c384 = arith.constant 384 : index
    %21 = vector.load %arg7[%c0_19, %c15, %c384] : memref<2x16x640xbf16, #tpu.memory_space<vmem>>, vector<2x1x128xbf16>
    tpu.vector_store %arg7[%c0_19, %c15, %c384], %20 {strides = array<i32>} : memref<2x16x640xbf16, #tpu.memory_space<vmem>>, vector<2x1x128xbf16>,
    %22 = vector.extract_strided_slice %10 {offsets = [0, 1, 0], sizes = [2, 15, 128], strides = [1, 1, 1]} : vector<2x16x128xbf16> to vector<2x15x128xbf16>
    %c0_20 = arith.constant 0 : index
    %c0_21 = arith.constant 0 : index
    %c384_22 = arith.constant 384 : index
    %23 = vector.load %arg7[%c0_20, %c0_21, %c384_22] : memref<2x16x640xbf16, #tpu.memory_space<vmem>>, vector<2x15x128xbf16>
    tpu.vector_store %arg7[%c0_20, %c0_21, %c384_22], %22 {strides = array<i32>} : memref<2x16x640xbf16, #tpu.memory_space<vmem>>, vector<2x15x128xbf16>,
    %cst_23 = arith.constant 0.000000e+00 : bf16
    %24 = vector.broadcast %cst_23 : bf16 to vector<2x2x128xbf16>
    %c0_24 = arith.constant 0 : index
    %c14 = arith.constant 14 : index
    %c512 = arith.constant 512 : index
    %25 = vector.load %arg7[%c0_24, %c14, %c512] : memref<2x16x640xbf16, #tpu.memory_space<vmem>>, vector<2x2x128xbf16>
    tpu.vector_store %arg7[%c0_24, %c14, %c512], %24 {strides = array<i32>} : memref<2x16x640xbf16, #tpu.memory_space<vmem>>, vector<2x2x128xbf16>,
    %26 = vector.extract_strided_slice %10 {offsets = [0, 2, 0], sizes = [2, 14, 128], strides = [1, 1, 1]} : vector<2x16x128xbf16> to vector<2x14x128xbf16>
    %c0_25 = arith.constant 0 : index
    %c0_26 = arith.constant 0 : index
    %c512_27 = arith.constant 512 : index
    %27 = vector.load %arg7[%c0_25, %c0_26, %c512_27] : memref<2x16x640xbf16, #tpu.memory_space<vmem>>, vector<2x14x128xbf16>
    tpu.vector_store %arg7[%c0_25, %c0_26, %c512_27], %26 {strides = array<i32>} : memref<2x16x640xbf16, #tpu.memory_space<vmem>>, vector<2x14x128xbf16>,
    %c0_28 = arith.constant 0 : index
    %c0_29 = arith.constant 0 : index
    %c0_30 = arith.constant 0 : index
    %28 = vector.load %arg7[%c0_28, %c0_29, %c0_30] : memref<2x16x640xbf16, #tpu.memory_space<vmem>>, vector<2x16x640xbf16>
    %29 = vector.shape_cast %28 : vector<2x16x640xbf16> to vector<32x640xbf16>
    %c0_31 = arith.constant 0 : index
    %c0_32 = arith.constant 0 : index
    %30 = vector.load %arg4[%c0_31, %c0_32] : memref<640x128xbf16, #tpu.memory_space<vmem>>, vector<640x128xbf16>
    %cst_33 = arith.constant dense<0.000000e+00> : vector<32x128xf32>
    %31 = tpu.matmul %29, %30, %cst_33 {dimension_numbers = #tpu.dot_dimension_numbers<[1], [0], [0], [1], [0, 0, 1, 1], [], []>} : vector<32x640xbf16>, vector<640x128xbf16>, vector<32x128xf32> -> vector<32x128xf32>
    %cst_34 = arith.constant 0.00999999977 : f32
    %32 = vector.broadcast %cst_34 : f32 to vector<32x128xf32>
    %33 = arith.mulf %32, %31 : vector<32x128xf32>
    %34 = arith.maximumf %31, %33 : vector<32x128xf32>
    %35 = vector.shape_cast %34 : vector<32x128xf32> to vector<2x16x128xf32>
    %36 = arith.truncf %35 : vector<2x16x128xf32> to vector<2x16x128xbf16>
    %c0_35 = arith.constant 0 : index
    %c0_36 = arith.constant 0 : index
    %c0_37 = arith.constant 0 : index
    %37 = vector.load %arg5[%c0_35, %c0_36, %c0_37] : memref<2x16x128xbf16, #tpu.memory_space<vmem>>, vector<2x16x128xbf16>
    tpu.vector_store %arg5[%c0_35, %c0_36, %c0_37], %36 {strides = array<i32>} : memref<2x16x128xbf16, #tpu.memory_space<vmem>>, vector<2x16x128xbf16>,
    %cst_38 = arith.constant dense<0.000000e+00> : vector<128xf32>
    %38 = vector.multi_reduction <add>, %34, %cst_38 [0] : vector<32x128xf32> to vector<128xf32>
    %39 = vector.shape_cast %38 : vector<128xf32> to vector<1x128xf32>
    %40 = arith.mulf %34, %34 : vector<32x128xf32>
    %cst_39 = arith.constant dense<0.000000e+00> : vector<128xf32>
    %41 = vector.multi_reduction <add>, %40, %cst_39 [0] : vector<32x128xf32> to vector<128xf32>
    %42 = vector.shape_cast %41 : vector<128xf32> to vector<1x128xf32>
    %43 = tpu.concatenate %39, %42 in 0 : vector<1x128xf32>, vector<1x128xf32> -> vector<2x128xf32>
    %c0_40 = arith.constant 0 : index
    %c0_41 = arith.constant 0 : index
    %c0_42 = arith.constant 0 : index
    %44 = vector.load %arg6[%c0_40, %c0_41, %c0_42] : memref<1x2x128xf32, #tpu.memory_space<vmem>>, vector<1x2x128xf32>
    %45 = vector.shape_cast %44 : vector<1x2x128xf32> to vector<2x128xf32>
    %46 = vector.shape_cast %43 : vector<2x128xf32> to vector<1x2x128xf32>
    tpu.vector_store %arg6[%c0_40, %c0_41, %c0_42], %46 {strides = array<i32>} : memref<1x2x128xf32, #tpu.memory_space<vmem>>, vector<1x2x128xf32>,
    return
  }
  func.func @transform_0(%arg0: i32) -> (i32, i32, i32) {
    %c0_i32 = arith.constant 0 : i32
    %c0_i32_0 = arith.constant 0 : i32
    %c0_i32_1 = arith.constant 0 : i32
    return %arg0, %c0_i32, %c0_i32_0 : i32, i32, i32
  }
  func.func @transform_1(%arg0: i32) -> (i32, i32) {
    %c0_i32 = arith.constant 0 : i32
    %c0_i32_0 = arith.constant 0 : i32
    %c0_i32_1 = arith.constant 0 : i32
    return %c0_i32, %c0_i32_0 : i32, i32
  }
  func.func @transform_2(%arg0: i32) -> (i32, i32) {
    %c0_i32 = arith.constant 0 : i32
    %c0_i32_0 = arith.constant 0 : i32
    %c0_i32_1 = arith.constant 0 : i32
    return %c0_i32, %c0_i32_0 : i32, i32
  }
  func.func @transform_3(%arg0: i32) -> (i32, i32) {
    %c0_i32 = arith.constant 0 : i32
    %c0_i32_0 = arith.constant 0 : i32
    %c0_i32_1 = arith.constant 0 : i32
    return %c0_i32, %c0_i32_0 : i32, i32
  }
  func.func @transform_4(%arg0: i32) -> (i32, i32, i32) {
    %c0_i32 = arith.constant 0 : i32
    %c0_i32_0 = arith.constant 0 : i32
    %c0_i32_1 = arith.constant 0 : i32
    return %arg0, %c0_i32, %c0_i32_0 : i32, i32, i32
  }
  func.func @transform_5(%arg0: i32) -> (i32, i32, i32) {
    %c0_i32 = arith.constant 0 : i32
    %c0_i32_0 = arith.constant 0 : i32
    %c0_i32_1 = arith.constant 0 : i32
    return %arg0, %c0_i32, %c0_i32_0 : i32, i32, i32
  }
}

module attributes {stable_mosaic.version = 11 : i64} {
  func.func @bn_affine_kernel(%arg0: i32, %arg1: memref<2x16x128xbf16, #tpu.memory_space<vmem>>, %arg2: memref<1x128xf32, #tpu.memory_space<vmem>>, %arg3: memref<1x128xf32, #tpu.memory_space<vmem>>, %arg4: memref<2x16x128xf32, #tpu.memory_space<vmem>>) attributes {dimension_semantics = [#tpu.dimension_semantics<parallel>], iteration_bounds = array<i64: 1>, scalar_prefetch = 0 : i64, scratch_operands = 0 : i64, tpu.core_type = #tpu.core_type<tc>, window_params = [{transform_indices = @transform_0, window_bounds = array<i64: 2, 16, 128>}, {pipeline_mode = #tpu.pipeline_mode<synchronous>, transform_indices = @transform_1, window_bounds = array<i64: 1, 128>}, {pipeline_mode = #tpu.pipeline_mode<synchronous>, transform_indices = @transform_2, window_bounds = array<i64: 1, 128>}, {transform_indices = @transform_3, window_bounds = array<i64: 2, 16, 128>}]} {
    %c0 = arith.constant 0 : index
    %c0_0 = arith.constant 0 : index
    %c0_1 = arith.constant 0 : index
    %0 = vector.load %arg1[%c0, %c0_0, %c0_1] : memref<2x16x128xbf16, #tpu.memory_space<vmem>>, vector<2x16x128xbf16>
    %1 = arith.extf %0 : vector<2x16x128xbf16> to vector<2x16x128xf32>
    %c0_2 = arith.constant 0 : index
    %c0_3 = arith.constant 0 : index
    %2 = vector.load %arg2[%c0_2, %c0_3] : memref<1x128xf32, #tpu.memory_space<vmem>>, vector<1x128xf32>
    %3 = vector.shape_cast %2 : vector<1x128xf32> to vector<1x1x128xf32>
    %4 = vector.broadcast %3 : vector<1x1x128xf32> to vector<2x16x128xf32>
    %5 = arith.mulf %1, %4 : vector<2x16x128xf32>
    %c0_4 = arith.constant 0 : index
    %c0_5 = arith.constant 0 : index
    %6 = vector.load %arg3[%c0_4, %c0_5] : memref<1x128xf32, #tpu.memory_space<vmem>>, vector<1x128xf32>
    %7 = vector.shape_cast %6 : vector<1x128xf32> to vector<1x1x128xf32>
    %8 = vector.broadcast %7 : vector<1x1x128xf32> to vector<2x16x128xf32>
    %9 = arith.addf %5, %8 : vector<2x16x128xf32>
    %c0_6 = arith.constant 0 : index
    %c0_7 = arith.constant 0 : index
    %c0_8 = arith.constant 0 : index
    %10 = vector.load %arg4[%c0_6, %c0_7, %c0_8] : memref<2x16x128xf32, #tpu.memory_space<vmem>>, vector<2x16x128xf32>
    tpu.vector_store %arg4[%c0_6, %c0_7, %c0_8], %9 {strides = array<i32>} : memref<2x16x128xf32, #tpu.memory_space<vmem>>, vector<2x16x128xf32>,
    return
  }
  func.func @transform_0(%arg0: i32) -> (i32, i32, i32) {
    %c0_i32 = arith.constant 0 : i32
    %c0_i32_0 = arith.constant 0 : i32
    %c0_i32_1 = arith.constant 0 : i32
    return %arg0, %c0_i32, %c0_i32_0 : i32, i32, i32
  }
  func.func @transform_1(%arg0: i32) -> (i32, i32) {
    %c0_i32 = arith.constant 0 : i32
    %c0_i32_0 = arith.constant 0 : i32
    %c0_i32_1 = arith.constant 0 : i32
    return %c0_i32, %c0_i32_0 : i32, i32
  }
  func.func @transform_2(%arg0: i32) -> (i32, i32) {
    %c0_i32 = arith.constant 0 : i32
    %c0_i32_0 = arith.constant 0 : i32
    %c0_i32_1 = arith.constant 0 : i32
    return %c0_i32, %c0_i32_0 : i32, i32
  }
  func.func @transform_3(%arg0: i32) -> (i32, i32, i32) {
    %c0_i32 = arith.constant 0 : i32
    %c0_i32_0 = arith.constant 0 : i32
    %c0_i32_1 = arith.constant 0 : i32
    return %arg0, %c0_i32, %c0_i32_0 : i32, i32, i32
  }
}

</mosaic_0001>

<bundles_post_ra>
// kernel: tile.28
= control target key start
LH: loop header
LB: loop body
LE: loop exit
PB: predicated region body
PF: predicated region fallthrough
CT: control target
= control target key end

     0   :  { %s28_s0 = inlined_call_operand.vmem [shape: f32[8], index: 0, kind: input, shape index: {}]   ;;  %s29_s1 = inlined_call_operand.vmem [shape: f32[16,8], index: 1, kind: output, shape index: {}]  }
   0x1   :  { %v4_v0 = vld [vmem:[%s28_s0] ss:$0 sm:$0xff] }
   0x2   :  { %5 = vst [vmem:[%s29_s1] sm:$0xff] %v4_v0  ;;  %8 = vst [vmem:[%s29_s1 + $0x8] sm:$0xff] %v4_v0 }

// kernel: tile.29
= control target key start
LH: loop header
LB: loop body
LE: loop exit
PB: predicated region body
PF: predicated region fallthrough
CT: control target
= control target key end

     0   :  { %s131_s10 = smov 120   ;;  %s132_s11 = smov 104   ;;  %vm3_vm0 = vcmask 64512   ;;  %vm9_vm1 = vcmask 1048512   ;;  %vm15_vm2 = vcmask 982912   ;;  %vm21_vm3 = vcmask 917312   ;;  %s207_s0 = inlined_call_operand.vmem [shape: f32[16,8], index: 0, kind: input, shape index: {}]   ;;  %s208_s1 = inlined_call_operand.vmem [shape: f32[1,128], index: 1, kind: output, shape index: {}]  }
   0x1   :  { %v101_v0 = vld [vmem:[%s207_s0 + $0xf] sm:$0x1]   ;;  %v103_v1 = vld [vmem:[%s207_s0 + $0xd] sm:$0x1]   ;;  %v102_v2 = vld [vmem:[%s207_s0 + $0xe] sm:$0x1]  }
   0x2   :  { %7 = vrot.lane.b32.xlu0 %v101_v0, %s131_s10  ;;  %19 = vrot.lane.b32.xlu1 %v103_v1, %s132_s11  ;;  %v104_v3 = vld [vmem:[%s207_s0 + $0xc] sm:$0x1]   ;;  %s133_s16 = smov 112   ;;  %s134_s17 = smov 96   ;;  %v105_v4 = vld [vmem:[%s207_s0 + $0xb] sm:$0x1]  }
   0x3   :  { %v106_v5 = vld [vmem:[%s207_s0 + $0xa] sm:$0x1]   ;;  %v2_v6 = vld [vmem:[%s207_s0] sm:$0x1]   ;;  %s135_s24 = smov 88   ;;  %s136_s25 = smov 80  }
   0x4   :  { %4 = vst.msk [vmem:[#allocation0] sm:$0x1] %vm3_vm0, %v2_v6   ;;  %v107_v7 = vld [vmem:[%s207_s0 + $0x9] sm:$0x1]   ;;  %v108_v8 = vld [vmem:[%s207_s0 + $0x8] sm:$0x1]  }
   0x5   :  { %s137_s30 = smov 72   ;;  %s138_s2 = smov 64   ;;  %v109_v9 = vld [vmem:[%s207_s0 + $0x7] sm:$0x1]   ;;  %v110_v10 = vld [vmem:[%s207_s0 + $0x6] sm:$0x1]  }
   0x6   :  { %13 = vrot.lane.b32.xlu0 %v102_v2, %s133_s16  ;;  %25 = vrot.lane.b32.xlu1 %v104_v3, %s134_s17  ;;  %s139_s7 = smov 56   ;;  %s140_s8 = smov 48   ;;  %v111_v11 = vld [vmem:[%s207_s0 + $0x5] sm:$0x1]   ;;  %v112_v12 = vld [vmem:[%s207_s0 + $0x4] sm:$0x1]  }
   0x7   :  { %s141_s13 = smov 40   ;;  %s142_s14 = smov 32   ;;  %v113_v13 = vld [vmem:[%s207_s0 + $0x3] sm:$0x1]   ;;  %v114_v14 = vld [vmem:[%s207_s0 + $0x2] sm:$0x1]  }
   0x8   :  { %s143_s19 = smov 24   ;;  %s144_s20 = smov 16   ;;  %v115_v15 = vld [vmem:[%s207_s0 + $0x1] sm:$0x1]   ;;  %vm27_vm4 = vcmask 851712   ;;  %vm33_vm5 = vcmask 786112  }
   0x9   :  { %s145_s0 = smov 8   ;;  %vm39_vm6 = vcmask 720512   ;;  %vm45_vm7 = vcmask 654912   ;;  %vm51_vm8 = vcmask 589312   ;;  %vm57_vm9 = vcmask 523712  }
   0xa   :  { %31 = vrot.lane.b32.xlu0 %v105_v4, %s135_s24  ;;  %37 = vrot.lane.b32.xlu1 %v106_v5, %s136_s25  ;;  %vm63_vm10 = vcmask 458112   ;;  %vm69_vm11 = vcmask 392512   ;;  %vm75_vm12 = vcmask 326912   ;;  %vm81_vm13 = vcmask 261312  }
   0xb   :  { %vm87_vm14 = vcmask 195712   ;;  %vm93_vm15 = vcmask 130112  }
   0xe   :  { %43 = vrot.lane.b32.xlu0 %v107_v7, %s137_s30  ;;  %49 = vrot.lane.b32.xlu1 %v108_v8, %s138_s2 }
  0x12   :  { %55 = vrot.lane.b32.xlu0 %v109_v9, %s139_s7  ;;  %61 = vrot.lane.b32.xlu1 %v110_v10, %s140_s8 }
  0x16   :  { %67 = vrot.lane.b32.xlu0 %v111_v11, %s141_s13  ;;  %73 = vrot.lane.b32.xlu1 %v112_v12, %s142_s14 }
  0x1a   :  { %79 = vrot.lane.b32.xlu0 %v113_v13, %s143_s19  ;;  %85 = vrot.lane.b32.xlu1 %v114_v14, %s144_s20 }
  0x1e   :  { %91 = vrot.lane.b32.xlu0 %v115_v15, %s145_s0 }
  0x74   :  { %v8_v16 = vpop.permute.xlu0 %7   ;;  %v20_v17 = vpop.permute.xlu1 %19  }
  0x75   :  { %10 = vst.msk [vmem:[#allocation0] sm:$0x1] %vm9_vm1, %v8_v16  }
  0x78   :  { %v14_v18 = vpop.permute.xlu0 %13   ;;  %v26_v19 = vpop.permute.xlu1 %25  }
  0x79   :  { %16 = vst.msk [vmem:[#allocation0] sm:$0x1] %vm15_vm2, %v14_v18  }
  0x7a   :  { %22 = vst.msk [vmem:[#allocation0] sm:$0x1] %vm21_vm3, %v20_v17  }
  0x7b   :  { %28 = vst.msk [vmem:[#allocation0] sm:$0x1] %vm27_vm4, %v26_v19  }
  0x7c   :  { %v32_v20 = vpop.permute.xlu0 %31   ;;  %v38_v21 = vpop.permute.xlu1 %37  }
  0x7d   :  { %34 = vst.msk [vmem:[#allocation0] sm:$0x1] %vm33_vm5, %v32_v20  }
  0x7e   :  { %40 = vst.msk [vmem:[#allocation0] sm:$0x1] %vm39_vm6, %v38_v21  }
  0x80   :  { %v44_v22 = vpop.permute.xlu0 %43   ;;  %v50_v23 = vpop.permute.xlu1 %49  }
  0x81   :  { %46 = vst.msk [vmem:[#allocation0] sm:$0x1] %vm45_vm7, %v44_v22  }
  0x82   :  { %52 = vst.msk [vmem:[#allocation0] sm:$0x1] %vm51_vm8, %v50_v23  }
  0x84   :  { %v56_v24 = vpop.permute.xlu0 %55   ;;  %v62_v25 = vpop.permute.xlu1 %61  }
  0x85   :  { %58 = vst.msk [vmem:[#allocation0] sm:$0x1] %vm57_vm9, %v56_v24  }
  0x86   :  { %64 = vst.msk [vmem:[#allocation0] sm:$0x1] %vm63_vm10, %v62_v25  }
  0x88   :  { %v68_v26 = vpop.permute.xlu0 %67   ;;  %v74_v27 = vpop.permute.xlu1 %73  }
  0x89   :  { %70 = vst.msk [vmem:[#allocation0] sm:$0x1] %vm69_vm11, %v68_v26  }
  0x8a   :  { %76 = vst.msk [vmem:[#allocation0] sm:$0x1] %vm75_vm12, %v74_v27  }
  0x8c   :  { %v80_v28 = vpop.permute.xlu0 %79   ;;  %v86_v29 = vpop.permute.xlu1 %85  }
  0x8d   :  { %82 = vst.msk [vmem:[#allocation0] sm:$0x1] %vm81_vm13, %v80_v28  }
  0x8e   :  { %88 = vst.msk [vmem:[#allocation0] sm:$0x1] %vm87_vm14, %v86_v29  }
  0x90   :  { %v92_v30 = vpop.permute.xlu0 %91  }
  0x91   :  { %94 = vst.msk [vmem:[#allocation0] sm:$0x1] %vm93_vm15, %v92_v30  }
  0x98   :  { %v98_v31 = vld [vmem:[#allocation0] sm:$0x1] }
  0x99   :  { %100 = vst [vmem:[%s208_s1] sm:$0x1] %v98_v31 }

// kernel: double_conv.3
= control target key start
LH: loop header
LB: loop body
LE: loop exit
PB: predicated region body
PF: predicated region fallthrough
CT: control target
= control target key end

     0   :  { %vm70_vm0 = vcmask 523264   ;;  %vm74_vm1 = vsmask.f32 7966  ;;  %vm20_vm2 = vcmask 516096   ;;  %vm107_vm3 = vcmask 522240   ;;  %s551_s29 = smov 64   ;;  %s679_s0 = inlined_call_operand.vmem [shape: f32[2,16,64], index: 0, kind: input, shape index: {}]   ;;  %s680_s1 = inlined_call_operand.vmem [shape: bf16[320,128], index: 1, kind: input, shape index: {}]   ;;  %s681_s2 = inlined_call_operand.vmem [shape: bf16[2,16,128], index: 2, kind: output, shape index: {0}]   ;;  %s682_s3 = inlined_call_operand.vmem [shape: f32[1,2,128], index: 3, kind: output, shape index: {1}]  }
   0x1   :  { %v14_v0 = vld [vmem:[%s679_s0] sm:$0xff]  ;;  %v15_v1 = vld [vmem:[%s679_s0 + $0x8] sm:$0xff]  ;;  %v16_v2 = vld [vmem:[%s679_s0 + $0x10] sm:$0xff]  ;;  %v550_v7 = vmov 0   ;;  %vm73_vm4 = vcmask 1048071   ;;  %vm29_vm5 = vcmask 523265  }
   0x2   :  { %v18_v3 = vpack.c.bf16 %v15_v1, %v14_v0  ;;  %v17_v4 = vld [vmem:[%s679_s0 + $0x18] sm:$0xff]  ;;  %v530_v6 = vld [vmem:[%s680_s1 + $0x40] sm:$0xff]   ;;  %21 = vst.msk [vmem:[#allocation2] sm:$0x1] %vm20_vm2, %v550_v7  ;;  %22 = vst.msk [vmem:[#allocation2 + $0x18] sm:$0x1] %vm20_vm2, %v550_v7 }
   0x3   :  { %v19_v5 = vpack.c.bf16 %v17_v4, %v16_v2  ;;  %v531_v11 = vld [vmem:[%s680_s1] sm:$0xff]   ;;  %482 = vmatprep.subr.bf16.mxu0 %v530_v6  ;;  %v532_v15 = vld [vmem:[%s680_s1 + $0x48] sm:$0xff]   ;;  %v534_v21 = vld [vmem:[%s680_s1 + $0x50] sm:$0xff]   ;;  %vm100_vm6 = vcmask 523271   ;;  %vm32_vm8 = vcmask 1040896   ;;  %vm61_vm11 = vcmask 1048064  }
   0x4   :  { %v42_v8 = vshrl.u32 %v18_v3, 16  ;;  %v45_v9 = vshll.u32 %v18_v3, 16  ;;  %v103_v10 = vrot.slane %v18_v3, 1  ;;  %71 = vst.msk [vmem:[#allocation2 + $0x8] sm:$0xff] %vm70_vm0, %v18_v3  ;;  %483 = vmatpush3.bf16.msra.mxu0 %v531_v11  ;;  %v533_v20 = vld [vmem:[%s680_s1 + $0x8] sm:$0xff]   ;;  %v535_v25 = vld [vmem:[%s680_s1 + $0x10] sm:$0xff]   ;;  %vm611_vm7 = vmand %vm73_vm4, %vm74_vm1 }
   0x5   :  { %v49_v12 = vshrl.u32 %v19_v5, 16  ;;  %v52_v13 = vshll.u32 %v19_v5, 16  ;;  %v104_v14 = vrot.slane %v19_v5, 1  ;;  %72 = vst.msk [vmem:[#allocation2 + $0x20] sm:$0xff] %vm70_vm0, %v19_v5  ;;  %484 = vmatprep.subr.bf16.mxu0 %v532_v15  ;;  %v536_v27 = vld [vmem:[%s680_s1 + $0x58] sm:$0xff]   ;;  %v25_v28 = vrot.slane %v18_v3, 7 }
   0x6   :  { %v82_v16 = vrot.slane %v45_v9, 1  ;;  %108 = vst.msk [vmem:[#allocation2 + $0x10] sm:$0x7f] %vm107_vm3, %v103_v10  ;;  %v44_v17 = vrot.slane %v42_v8, 7  ;;  %v26_v30 = vrot.slane %v19_v5, 7  ;;  %v537_v31 = vld [vmem:[%s680_s1 + $0x18] sm:$0xff]  }
   0x7   :  { %v84_v18 = vrot.slane %v52_v13, 1  ;;  %109 = vst.msk [vmem:[#allocation2 + $0x28] sm:$0x7f] %vm107_vm3, %v104_v14  ;;  %v51_v19 = vrot.slane %v49_v12, 7  ;;  %v540_v32 = vld [vmem:[%s680_s1 + $0x80] sm:$0xff]   ;;  %v543_v36 = vld [vmem:[%s680_s1 + $0x88] sm:$0xff]  }
   0x8   :  { %v83_v22 = vor.u32 %v82_v16, %v42_v8  ;;  %v47_v24 = vor.u32 %v45_v9, %v44_v17  ;;  %485 = vmatpush3.bf16.msra.mxu0 %v533_v20  ;;  %101 = vst.msk [vmem:[#allocation2 + $0x10] sm:$0x80] %vm100_vm6, %v550_v7  ;;  %102 = vst.msk [vmem:[#allocation2 + $0x28] sm:$0x80] %vm100_vm6, %v550_v7  ;;  %v538_v34 = vld [vmem:[%s680_s1 + $0x60] sm:$0xff]   ;;  %516 = vmatprep.subr.bf16.mxu1 %v540_v32  ;;  %v541_v38 = vld [vmem:[%s680_s1 + $0x68] sm:$0xff]  }
   0x9   :  { %v85_v23 = vor.u32 %v84_v18, %v49_v12  ;;  %v54_v26 = vor.u32 %v52_v13, %v51_v19  ;;  %486 = vmatprep.subr.bf16.mxu0 %v534_v21  ;;  %30 = vst.msk [vmem:[#allocation2] sm:$0xfe] %vm29_vm5, %v25_v28  ;;  %31 = vst.msk [vmem:[#allocation2 + $0x18] sm:$0xfe] %vm29_vm5, %v26_v30  ;;  %517 = vmatpush3.bf16.msra.mxu1 %v540_v32  ;;  %v539_v37 = vld [vmem:[%s680_s1 + $0x20] sm:$0xff]   ;;  %v542_v42 = vld [vmem:[%s680_s1 + $0x28] sm:$0xff]  }
   0xa   :  { %86 = vrot.lane.b32.xlu0 %v83_v22, %s551_s29  ;;  %vm33_vm9 = vsmask.f32 256  ;;  %v35_v39 = vld [vmem:[#allocation2] sm:$0x1]  ;;  %518 = vmatprep.subr.bf16.mxu1 %v543_v36  ;;  %v546_v43 = vld [vmem:[%s680_s1 + $0x90] sm:$0xff]   ;;  %v549_v48 = vld [vmem:[%s680_s1 + $0x98] sm:$0xff]  }
   0xb   :  { %88 = vrot.lane.b32.xlu1 %v85_v23, %s551_s29  ;;  %v76_v33 = vld [vmem:[#allocation2 + $0x8] sm:$0x80]  ;;  %vm637_vm10 = vmand %vm32_vm8, %vm33_vm9  ;;  %v544_v45 = vld [vmem:[%s680_s1 + $0x70] sm:$0xff]   ;;  %vm92_vm12 = vsmask.f32 7424 }
   0xc   :  { %487 = vmatpush3.bf16.msra.mxu0 %v535_v25  ;;  %v77_v35 = vsel %vm611_vm7, 0, %v76_v33  ;;  %v36_v41 = vsel %vm637_vm10, 0, %v35_v39  ;;  %v79_v44 = vld [vmem:[#allocation2 + $0x20] sm:$0x80]  ;;  %v545_v47 = vld [vmem:[%s680_s1 + $0x30] sm:$0xff]   ;;  %v547_v51 = vld [vmem:[%s680_s1 + $0x78] sm:$0xff]  }
   0xd   :  { %488 = vmatprep.subr.bf16.mxu0 %v536_v27  ;;  %78 = vst [vmem:[#allocation2 + $0x8] sm:$0x80] %v77_v35  ;;  %37 = vst [vmem:[#allocation2] sm:$0x1] %v36_v41  ;;  %519 = vmatpush3.bf16.msra.mxu1 %v543_v36  ;;  %v80_v46 = vsel %vm611_vm7, 0, %v79_v44  ;;  %v548_v54 = vld [vmem:[%s680_s1 + $0x38] sm:$0xff]  }
   0xe   :  { %55 = vrot.lane.b32.xlu0 %v47_v24, %s551_s29  ;;  %520 = vmatprep.subr.bf16.mxu1 %v546_v43  ;;  %81 = vst [vmem:[#allocation2 + $0x20] sm:$0x80] %v80_v46  ;;  %v38_v49 = vld [vmem:[#allocation2 + $0x18] sm:$0x1]  ;;  %vm93_vm13 = vmand %vm61_vm11, %vm92_vm12  ;;  %vm62_vm14 = vsmask.f32 7938 }
   0xf   :  { %57 = vrot.lane.b32.xlu1 %v54_v26, %s551_s29  ;;  %v112_v50 = vld [vmem:[#allocation2 + $0x10] sm:$0xff]  ;;  %v39_v52 = vsel %vm637_vm10, 0, %v38_v49  ;;  %v115_v53 = vld [vmem:[#allocation2 + $0x28] sm:$0xff]  ;;  %vm63_vm15 = vmand %vm61_vm11, %vm62_vm14 }
  0x10   :  { %489 = vmatpush3.bf16.msra.mxu0 %v537_v31  ;;  %524 = vmatprep.mubr.msk.bf16.mxu1 %vm70_vm0, %v112_v50  ;;  %40 = vst [vmem:[#allocation2 + $0x18] sm:$0x1] %v39_v52 }
  0x11   :  { %490 = vmatprep.subr.bf16.mxu0 %v538_v34  ;;  %521 = vmatpush3.bf16.msra.mxu1 %v546_v43 }
  0x12   :  { %522 = vmatprep.subr.bf16.mxu1 %v549_v48 }
  0x14   :  { %491 = vmatpush3.bf16.msra.mxu0 %v539_v37  ;;  %v94_v55 = vld [vmem:[#allocation2 + $0x8] sm:$0xff]  ;;  %v64_v60 = vld [vmem:[#allocation2] sm:$0xff] }
  0x15   :  { %492 = vmatprep.subr.bf16.mxu0 %v541_v38  ;;  %523 = vmatpush3.bf16.msra.mxu1 %v549_v48  ;;  %v97_v56 = vld [vmem:[#allocation2 + $0x20] sm:$0xff] }
  0x17   :  { %v67_v62 = vld [vmem:[#allocation2 + $0x18] sm:$0xff] }
  0x18   :  { %493 = vmatpush3.bf16.msra.mxu0 %v542_v42  ;;  %525 = vmatmul.mubr.msk.bf16.vlgmr.msra.gmra.mrb[0].mxu1 %vm70_vm0, %v115_v53  ;;  %vm430_vm0 = vcmask 1040384  }
  0x19   :  { %494 = vmatprep.subr.bf16.mxu0 %v544_v45 }
  0x1c   :  { %495 = vmatpush3.bf16.msra.mxu0 %v545_v47 }
  0x1d   :  { %496 = vmatprep.subr.bf16.mxu0 %v547_v51 }
  0x20   :  { %497 = vmatpush3.bf16.msra.mxu0 %v548_v54 }
  0x7c   :  { %v87_v57 = vpop.permute.xlu0 %86 }
  0x7d   :  { %v95_v58 = vsel %vm93_vm13, %v87_v57, %v94_v55  ;;  %v89_v59 = vpop.permute.xlu1 %88 }
  0x7e   :  { %96 = vst [vmem:[#allocation2 + $0x8] sm:$0xff] %v95_v58  ;;  %v98_v61 = vsel %vm93_vm13, %v89_v59, %v97_v56  ;;  %314 = vmatprep.mubr.bf16.mxu0 %v95_v58 }
  0x7f   :  { %99 = vst [vmem:[#allocation2 + $0x20] sm:$0xff] %v98_v61 }
  0x80   :  { %v56_v63 = vpop.permute.xlu0 %55 }
  0x81   :  { %v65_v0 = vsel %vm63_vm15, %v56_v63, %v64_v60  ;;  %v58_v1 = vpop.permute.xlu1 %57 }
  0x82   :  { %66 = vst [vmem:[#allocation2] sm:$0xff] %v65_v0  ;;  %v68_v2 = vsel %vm63_vm15, %v58_v1, %v67_v62  ;;  %315 = vmatmul.mubr.bf16.vlgmr.msra.gmra.mrb[0].mxu0 %v65_v0 }
  0x83   :  { %69 = vst [vmem:[#allocation2 + $0x18] sm:$0xff] %v68_v2  ;;  %322 = vmatprep.mubr.bf16.mxu0 %v98_v61 }
  0x8a   :  { %323 = vmatmul.mubr.bf16.gmra.mrb[4].mxu0 %v68_v2 }
  0xeb   :  { %v526_v3 = vpop.f32.mrb[0].mxu1 }
  0xec   :  { %v365_v4 = vpop.f32.mrb[1].mxu1 }
  0xed   :  { %v527_v5 = vpop.f32.mrb[2].mxu1 }
  0xee   :  { %v368_v6 = vpop.f32.mrb[3].mxu1 }
 0x155   :  { %v498_v7 = vpop.f32.mrb[0].mxu0 }
 0x156   :  { %v499_v8 = vpop.f32.mrb[1].mxu0 }
 0x157   :  { %v500_v9 = vadd.f32 %v499_v8, %v498_v7  ;;  %v501_v10 = vpop.f32.mrb[2].mxu0 }
 0x158   :  { %v502_v11 = vpop.f32.mrb[3].mxu0 }
 0x159   :  { %v503_v12 = vadd.f32 %v502_v11, %v501_v10  ;;  %v366_v13 = vadd.f32 %v500_v9, %v365_v4 }
 0x15b   :  { %v380_v14 = vmul.f32 0.01, %v366_v13  ;;  %v369_v15 = vadd.f32 %v503_v12, %v368_v6 }
 0x15d   :  { %v384_v16 = vmax.f32 %v366_v13, %v380_v14  ;;  %v381_v17 = vmul.f32 0.01, %v369_v15  ;;  %v504_v18 = vpop.f32.mrb[4].mxu0 }
 0x15e   :  { %v505_v19 = vpop.f32.mrb[5].mxu0 }
 0x15f   :  { %v385_v20 = vmax.f32 %v369_v15, %v381_v17  ;;  %v506_v21 = vadd.f32 %v505_v19, %v504_v18  ;;  %v507_v22 = vpop.f32.mrb[6].mxu0  ;;  %v417_v23 = vmul.f32 %v384_v16, %v384_v16 }
 0x160   :  { %v508_v24 = vpop.f32.mrb[7].mxu0 }
 0x161   :  { %v474_v25 = vpack.c.bf16 %v385_v20, %v384_v16  ;;  %v408_v26 = vadd.f32 %v385_v20, %v384_v16  ;;  %v418_v27 = vmul.f32 %v385_v20, %v385_v20  ;;  %v374_v28 = vadd.f32 %v526_v3, %v506_v21 }
 0x162   :  { %v509_v29 = vadd.f32 %v508_v24, %v507_v22 }
 0x163   :  { %475 = vst [vmem:[%s681_s2] sm:$0xff] %v474_v25   ;;  %v421_v30 = vadd.f32 %v418_v27, %v417_v23  ;;  %v382_v31 = vmul.f32 0.01, %v374_v28 }
 0x164   :  { %v377_v32 = vadd.f32 %v527_v5, %v509_v29 }
 0x165   :  { %v386_v33 = vmax.f32 %v374_v28, %v382_v31 }
 0x166   :  { %v383_v34 = vmul.f32 0.01, %v377_v32 }
 0x167   :  { %v409_v35 = vadd.f32 %v408_v26, %v386_v33  ;;  %v419_v36 = vmul.f32 %v386_v33, %v386_v33 }
 0x168   :  { %v387_v37 = vmax.f32 %v377_v32, %v383_v34 }
 0x169   :  { %v422_v38 = vadd.f32 %v421_v30, %v419_v36 }
 0x16a   :  { %v479_v39 = vpack.c.bf16 %v387_v37, %v386_v33  ;;  %v410_v40 = vadd.f32 %v409_v35, %v387_v37  ;;  %v420_v41 = vmul.f32 %v387_v37, %v387_v37 }
 0x16c   :  { %481 = vst [vmem:[%s681_s2 + $0x8] sm:$0xff] %v479_v39   ;;  %v411_v42 = vrot.slane %v410_v40, 4  ;;  %v423_v43 = vadd.f32 %v422_v38, %v420_v41 }
 0x16e   :  { %v412_v44 = vadd.f32 %v411_v42, %v410_v40  ;;  %v424_v45 = vrot.slane %v423_v43, 4 }
 0x170   :  { %v413_v46 = vrot.slane %v412_v44, 2  ;;  %v425_v47 = vadd.f32 %v424_v45, %v423_v43 }
 0x172   :  { %v414_v48 = vadd.f32 %v413_v46, %v412_v44  ;;  %v426_v49 = vrot.slane %v425_v47, 2 }
 0x174   :  { %v415_v50 = vrot.slane %v414_v48, 1  ;;  %v427_v51 = vadd.f32 %v426_v49, %v425_v47 }
 0x176   :  { %v428_v52 = vrot.slane %v427_v51, 1  ;;  %v416_v53 = vadd.f32 %v415_v50, %v414_v48 }
 0x178   :  { %v429_v54 = vadd.f32 %v428_v52, %v427_v51 }
 0x17a   :  { %v431_v55 = vsel %vm430_vm0, %v416_v53, %v429_v54 }
 0x17b   :  { %432 = vst [vmem:[%s682_s3] sm:$0x3] %v431_v55 }

// kernel: double_conv.4
= control target key start
LH: loop header
LB: loop body
LE: loop exit
PB: predicated region body
PF: predicated region fallthrough
CT: control target
= control target key end

     0   :  { %v864_v3 = vmov 0   ;;  %vm63_vm0 = vsmask.f32 256  ;;  %v65_v31 = vld [vmem:[#allocation2 + $0x8] sm:$0x1]  ;;  %vm62_vm1 = vcmask 1040384   ;;  %s1074_s3 = inlined_call_operand.vmem [shape: bf16[640,128], index: 3, kind: input, shape index: {}]   ;;  %s1075_s0 = inlined_call_operand.vmem [shape: bf16[2,16,128], index: 0, kind: input, shape index: {}]   ;;  %s1076_s1 = inlined_call_operand.vmem [shape: f32[1,128], index: 1, kind: input, shape index: {}]   ;;  %s1077_s2 = inlined_call_operand.vmem [shape: f32[1,128], index: 2, kind: input, shape index: {}]   ;;  %s1078_s4 = inlined_call_operand.vmem [shape: bf16[2,16,128], index: 4, kind: output, shape index: {0}]   ;;  %s1079_s5 = inlined_call_operand.vmem [shape: f32[1,2,128], index: 5, kind: output, shape index: {1}]  }
   0x1   :  { %v824_v0 = vld [vmem:[%s1074_s3 + $0x40] sm:$0xff]   ;;  %52 = vst [vmem:[#allocation2] sm:$0x1] %v864_v3  ;;  %53 = vst [vmem:[#allocation2 + $0x28] sm:$0x1] %v864_v3  ;;  %v828_v5 = vld [vmem:[%s1074_s3 + $0x48] sm:$0xff]  }
   0x2   :  { %v825_v1 = vld [vmem:[%s1074_s3 + $0xc0] sm:$0xff]   ;;  %737 = vmatprep.subr.bf16.mxu0 %v824_v0  ;;  %121 = vst [vmem:[#allocation2 + $0x20] sm:$0x80] %v864_v3  ;;  %122 = vst [vmem:[#allocation2 + $0x48] sm:$0x80] %v864_v3  ;;  %v829_v6 = vld [vmem:[%s1074_s3 + $0xc8] sm:$0xff]  }
   0x3   :  { %v826_v2 = vld [vmem:[%s1074_s3] sm:$0xff]   ;;  %765 = vmatprep.subr.bf16.mxu1 %v825_v1  ;;  %v830_v7 = vld [vmem:[%s1074_s3 + $0x8] sm:$0xff]   ;;  %v832_v9 = vld [vmem:[%s1074_s3 + $0x50] sm:$0xff]   ;;  %vm98_vm2 = vcmask 1047559   ;;  %vm99_vm4 = vsmask.f32 7966 }
   0x4   :  { %v827_v4 = vld [vmem:[%s1074_s3 + $0x80] sm:$0xff]   ;;  %738 = vmatpush3.bf16.msra.mxu0 %v826_v2  ;;  %v831_v8 = vld [vmem:[%s1074_s3 + $0x88] sm:$0xff]   ;;  %v833_v10 = vld [vmem:[%s1074_s3 + $0xd0] sm:$0xff]   ;;  %vm87_vm6 = vcmask 1047552   ;;  %vm88_vm7 = vsmask.f32 7938 }
   0x5   :  { %766 = vmatpush3.bf16.msra.mxu1 %v827_v4  ;;  %739 = vmatprep.subr.bf16.mxu0 %v828_v5  ;;  %v834_v11 = vld [vmem:[%s1074_s3 + $0x10] sm:$0xff]   ;;  %v836_v13 = vld [vmem:[%s1074_s3 + $0x58] sm:$0xff]   ;;  %v840_v17 = vld [vmem:[%s1074_s3 + $0x60] sm:$0xff]   ;;  %vm113_vm8 = vsmask.f32 7424 }
   0x6   :  { %767 = vmatprep.subr.bf16.mxu1 %v829_v6  ;;  %v835_v12 = vld [vmem:[%s1074_s3 + $0x90] sm:$0xff]   ;;  %v837_v14 = vld [vmem:[%s1074_s3 + $0xd8] sm:$0xff]   ;;  %v841_v18 = vld [vmem:[%s1074_s3 + $0xe0] sm:$0xff]  }
   0x7   :  { %v838_v15 = vld [vmem:[%s1074_s3 + $0x18] sm:$0xff]   ;;  %v842_v19 = vld [vmem:[%s1074_s3 + $0x20] sm:$0xff]   ;;  %v844_v21 = vld [vmem:[%s1074_s3 + $0x68] sm:$0xff]  }
   0x8   :  { %740 = vmatpush3.bf16.msra.mxu0 %v830_v7  ;;  %v839_v16 = vld [vmem:[%s1074_s3 + $0x98] sm:$0xff]   ;;  %v843_v20 = vld [vmem:[%s1074_s3 + $0xa0] sm:$0xff]   ;;  %v845_v22 = vld [vmem:[%s1074_s3 + $0xe8] sm:$0xff]  }
   0x9   :  { %768 = vmatpush3.bf16.msra.mxu1 %v831_v8  ;;  %741 = vmatprep.subr.bf16.mxu0 %v832_v9  ;;  %v846_v23 = vld [vmem:[%s1074_s3 + $0x28] sm:$0xff]   ;;  %v848_v25 = vld [vmem:[%s1074_s3 + $0x70] sm:$0xff]   ;;  %v852_v29 = vld [vmem:[%s1074_s3 + $0x78] sm:$0xff]  }
   0xa   :  { %769 = vmatprep.subr.bf16.mxu1 %v833_v10  ;;  %v847_v24 = vld [vmem:[%s1074_s3 + $0xa8] sm:$0xff]   ;;  %v849_v26 = vld [vmem:[%s1074_s3 + $0xf0] sm:$0xff]   ;;  %v853_v30 = vld [vmem:[%s1074_s3 + $0xf8] sm:$0xff]  }
   0xb   :  { %v850_v27 = vld [vmem:[%s1074_s3 + $0x30] sm:$0xff]   ;;  %v854_v32 = vld [vmem:[%s1074_s3 + $0x38] sm:$0xff]   ;;  %v718_v34 = vld [vmem:[%s1075_s0] sm:$0xff]  }
   0xc   :  { %742 = vmatpush3.bf16.msra.mxu0 %v834_v11  ;;  %v851_v28 = vld [vmem:[%s1074_s3 + $0xb0] sm:$0xff]   ;;  %v855_v33 = vld [vmem:[%s1074_s3 + $0xb8] sm:$0xff]   ;;  %v667_v35 = vld [vmem:[%s1076_s1] ss:$0 sm:$0xff]  ;;  %v719_v36 = vunpack.c.l.bf16 %v718_v34  ;;  %v720_v37 = vunpack.c.h.bf16 %v718_v34 }
   0xd   :  { %770 = vmatpush3.bf16.msra.mxu1 %v835_v12  ;;  %743 = vmatprep.subr.bf16.mxu0 %v836_v13  ;;  %vm999_vm3 = vmand %vm62_vm1, %vm63_vm0  ;;  %v101_v39 = vld [vmem:[#allocation2 + $0x18] sm:$0x80]  ;;  %v668_v40 = vld [vmem:[%s1077_s2] ss:$0 sm:$0xff] }
   0xe   :  { %771 = vmatprep.subr.bf16.mxu1 %v837_v14  ;;  %v66_v41 = vsel %vm999_vm3, 0, %v65_v31  ;;  %v856_v42 = vld [vmem:[%s1074_s3 + $0x100] sm:$0xff]   ;;  %v35_v43 = vmul.f32 %v719_v36, %v667_v35  ;;  %v36_v44 = vmul.f32 %v720_v37, %v667_v35  ;;  %vm1011_vm5 = vmand %vm98_vm2, %vm99_vm4  ;;  %v735_v50 = vld [vmem:[%s1075_s0 + $0x8] sm:$0xff]  }
   0xf   :  { %67 = vst [vmem:[#allocation2 + $0x8] sm:$0x1] %v66_v41  ;;  %v102_v46 = vsel %vm1011_vm5, 0, %v101_v39  ;;  %v68_v51 = vld [vmem:[#allocation2 + $0x30] sm:$0x1]  ;;  %v723_v56 = vunpack.c.l.bf16 %v735_v50  ;;  %vm1021_vm9 = vmand %vm87_vm6, %vm88_vm7  ;;  %v724_v59 = vunpack.c.h.bf16 %v735_v50  ;;  %v857_v12 = vld [vmem:[%s1074_s3 + $0x108] sm:$0xff]  }
  0x10   :  { %744 = vmatpush3.bf16.msra.mxu0 %v838_v15  ;;  %v46_v47 = vadd.f32 %v668_v40, %v35_v43  ;;  %v47_v48 = vadd.f32 %v668_v40, %v36_v44  ;;  %103 = vst [vmem:[#allocation2 + $0x18] sm:$0x80] %v102_v46  ;;  %v104_v52 = vld [vmem:[#allocation2 + $0x40] sm:$0x80]  ;;  %v69_v60 = vsel %vm999_vm3, 0, %v68_v51  ;;  %vm1031_vm10 = vmand %vm87_vm6, %vm113_vm8  ;;  %v861_v31 = vld [vmem:[%s1074_s3 + $0x128] sm:$0xff]  }
  0x11   :  { %772 = vmatpush3.bf16.msra.mxu1 %v839_v16  ;;  %745 = vmatprep.subr.bf16.mxu0 %v840_v17  ;;  %v105_v61 = vsel %vm1011_vm5, 0, %v104_v52  ;;  %v37_v1 = vmul.f32 %v723_v56, %v667_v35  ;;  %70 = vst [vmem:[#allocation2 + $0x30] sm:$0x1] %v69_v60  ;;  %v38_v3 = vmul.f32 %v724_v59, %v667_v35 }
  0x12   :  { %773 = vmatprep.subr.bf16.mxu1 %v841_v18  ;;  %v50_v49 = vpack.c.bf16 %v47_v48, %v46_v47  ;;  %106 = vst [vmem:[#allocation2 + $0x40] sm:$0x80] %v105_v61 }
  0x13   :  { %v48_v7 = vadd.f32 %v668_v40, %v37_v1  ;;  %v49_v8 = vadd.f32 %v668_v40, %v38_v3 }
  0x14   :  { %746 = vmatpush3.bf16.msra.mxu0 %v842_v19  ;;  %v72_v53 = vshrl.u32 %v50_v49, 16  ;;  %v75_v54 = vshll.u32 %v50_v49, 16  ;;  %v56_v55 = vrot.slane %v50_v49, 7  ;;  %v123_v4 = vrot.slane %v50_v49, 1 }
  0x15   :  { %774 = vmatpush3.bf16.msra.mxu1 %v843_v20  ;;  %747 = vmatprep.subr.bf16.mxu0 %v844_v21  ;;  %v51_v11 = vpack.c.bf16 %v49_v8, %v48_v7  ;;  %v858_v20 = vld [vmem:[%s1074_s3 + $0x110] sm:$0xff]  }
  0x16   :  { %775 = vmatprep.subr.bf16.mxu1 %v845_v22  ;;  %v90_v58 = vld [vmem:[#allocation2 + $0x8] sm:$0xff]  ;;  %v74_v62 = vrot.slane %v72_v53, 7  ;;  %v107_v63 = vrot.slane %v75_v54, 1  ;;  %60 = vst [vmem:[#allocation2] sm:$0xfe] %v56_v55 }
  0x17   :  { %v115_v2 = vld [vmem:[#allocation2 + $0x18] sm:$0xff]  ;;  %127 = vst [vmem:[#allocation2 + $0x20] sm:$0x7f] %v123_v4  ;;  %v79_v14 = vshrl.u32 %v51_v11, 16  ;;  %v82_v15 = vshll.u32 %v51_v11, 16  ;;  %v57_v16 = vrot.slane %v51_v11, 7 }
  0x18   :  { %748 = vmatpush3.bf16.msra.mxu0 %v846_v23  ;;  %v77_v5 = vor.u32 %v75_v54, %v74_v62  ;;  %v108_v6 = vor.u32 %v107_v63, %v72_v53  ;;  %v124_v17 = vrot.slane %v51_v11, 1  ;;  %v93_v21 = vld [vmem:[#allocation2 + $0x30] sm:$0xff] }
  0x19   :  { %776 = vmatpush3.bf16.msra.mxu1 %v847_v24  ;;  %749 = vmatprep.subr.bf16.mxu0 %v848_v25  ;;  %v81_v18 = vrot.slane %v79_v14, 7  ;;  %v109_v19 = vrot.slane %v82_v15, 1  ;;  %61 = vst [vmem:[#allocation2 + $0x28] sm:$0xfe] %v57_v16  ;;  %v118_v22 = vld [vmem:[#allocation2 + $0x40] sm:$0xff] }
  0x1a   :  { %777 = vmatprep.subr.bf16.mxu1 %v849_v26  ;;  %v91_v9 = vsel %vm1021_vm9, %v77_v5, %v90_v58  ;;  %v116_v10 = vsel %vm1031_vm10, %v108_v6, %v115_v2  ;;  %128 = vst [vmem:[#allocation2 + $0x48] sm:$0x7f] %v124_v17 }
  0x1b   :  { %92 = vst [vmem:[#allocation2 + $0x8] sm:$0xff] %v91_v9  ;;  %491 = vmatprep.mubr.bf16.mxu0 %v91_v9  ;;  %117 = vst [vmem:[#allocation2 + $0x18] sm:$0xff] %v116_v10  ;;  %540 = vmatprep.mubr.bf16.mxu1 %v116_v10  ;;  %v84_v23 = vor.u32 %v82_v15, %v81_v18  ;;  %v110_v24 = vor.u32 %v109_v19, %v79_v14 }
  0x1c   :  { %750 = vmatpush3.bf16.msra.mxu0 %v850_v27  ;;  %v859_v27 = vld [vmem:[%s1074_s3 + $0x118] sm:$0xff]  }
  0x1d   :  { %778 = vmatpush3.bf16.msra.mxu1 %v851_v28  ;;  %751 = vmatprep.subr.bf16.mxu0 %v852_v29  ;;  %v129_v13 = vld [vmem:[#allocation2] sm:$0xff]  ;;  %v94_v25 = vsel %vm1021_vm9, %v84_v23, %v93_v21  ;;  %v119_v26 = vsel %vm1031_vm10, %v110_v24, %v118_v22 }
  0x1e   :  { %779 = vmatprep.subr.bf16.mxu1 %v853_v30  ;;  %95 = vst [vmem:[#allocation2 + $0x30] sm:$0xff] %v94_v25  ;;  %120 = vst [vmem:[#allocation2 + $0x40] sm:$0xff] %v119_v26  ;;  %v133_v29 = vld [vmem:[#allocation2 + $0x20] sm:$0xff] }
  0x1f   :  { %v860_v30 = vld [vmem:[%s1074_s3 + $0x120] sm:$0xff]  }
  0x20   :  { %752 = vmatpush3.bf16.msra.mxu0 %v854_v32  ;;  %v134_v28 = vld [vmem:[#allocation2 + $0x28] sm:$0xff]  ;;  %v862_v32 = vld [vmem:[%s1074_s3 + $0x130] sm:$0xff]  }
  0x21   :  { %780 = vmatpush3.bf16.msra.mxu1 %v855_v33  ;;  %803 = vmatprep.subr.bf16.mxu0 %v856_v42  ;;  %v863_v33 = vld [vmem:[%s1074_s3 + $0x138] sm:$0xff]   ;;  %v138_v34 = vld [vmem:[#allocation2 + $0x48] sm:$0xff] }
  0x23   :  { %492 = vmatmul.mubr.bf16.vlgmr.msra.gmra.mrb[0].mxu0 %v129_v13 }
  0x24   :  { %541 = vmatmul.mubr.bf16.vlgmr.msra.gmra.mrb[0].mxu1 %v50_v49  ;;  %804 = vmatpush3.bf16.msra.mxu0 %v856_v42 }
  0x25   :  { %805 = vmatprep.subr.bf16.mxu0 %v857_v12  ;;  %499 = vmatprep.mubr.bf16.mxu0 %v94_v25 }
  0x26   :  { %548 = vmatprep.mubr.bf16.mxu1 %v119_v26 }
  0x28   :  { %806 = vmatpush3.bf16.msra.mxu0 %v857_v12 }
  0x29   :  { %807 = vmatprep.subr.bf16.mxu0 %v858_v20 }
  0x2b   :  { %500 = vmatmul.mubr.bf16.gmra.mrb[4].mxu0 %v134_v28 }
  0x2c   :  { %549 = vmatmul.mubr.bf16.gmra.mrb[4].mxu1 %v51_v11  ;;  %808 = vmatpush3.bf16.msra.mxu0 %v858_v20 }
  0x2d   :  { %809 = vmatprep.subr.bf16.mxu0 %v859_v27  ;;  %819 = vmatprep.mubr.bf16.mxu0 %v133_v29 }
  0x30   :  { %810 = vmatpush3.bf16.msra.mxu0 %v859_v27 }
  0x31   :  { %811 = vmatprep.subr.bf16.mxu0 %v860_v30 }
  0x34   :  { %812 = vmatpush3.bf16.msra.mxu0 %v860_v30 }
  0x35   :  { %813 = vmatprep.subr.bf16.mxu0 %v861_v31 }
  0x38   :  { %814 = vmatpush3.bf16.msra.mxu0 %v861_v31 }
  0x39   :  { %815 = vmatprep.subr.bf16.mxu0 %v862_v32 }
  0x3c   :  { %816 = vmatpush3.bf16.msra.mxu0 %v862_v32 }
  0x3d   :  { %817 = vmatprep.subr.bf16.mxu0 %v863_v33 }
  0x40   :  { %818 = vmatpush3.bf16.msra.mxu0 %v863_v33 }
  0x43   :  { %820 = vmatmul.mubr.bf16.vlgmr.msra.gmra.mrb[8].mxu0 %v138_v34 }
  0xf6   :  { %v753_v37 = vpop.f32.mrb[0].mxu0 }
  0xf7   :  { %v781_v35 = vpop.f32.mrb[0].mxu1  ;;  %v754_v40 = vpop.f32.mrb[1].mxu0 }
  0xf8   :  { %v782_v36 = vpop.f32.mrb[1].mxu1  ;;  %v755_v42 = vadd.f32 %v754_v40, %v753_v37  ;;  %v756_v43 = vpop.f32.mrb[2].mxu0 }
  0xf9   :  { %v783_v38 = vadd.f32 %v782_v36, %v781_v35  ;;  %v784_v39 = vpop.f32.mrb[2].mxu1  ;;  %v757_v45 = vpop.f32.mrb[3].mxu0 }
  0xfa   :  { %v785_v41 = vpop.f32.mrb[3].mxu1  ;;  %v758_v46 = vadd.f32 %v757_v45, %v756_v43 }
  0xfb   :  { %v786_v44 = vadd.f32 %v785_v41, %v784_v39  ;;  %v543_v47 = vadd.f32 %v783_v38, %v755_v42 }
  0xfd   :  { %v546_v48 = vadd.f32 %v786_v44, %v758_v46 }
  0xfe   :  { %v759_v51 = vpop.f32.mrb[4].mxu0 }
  0xff   :  { %v787_v49 = vpop.f32.mrb[4].mxu1  ;;  %v760_v54 = vpop.f32.mrb[5].mxu0 }
 0x100   :  { %v788_v50 = vpop.f32.mrb[5].mxu1  ;;  %v761_v56 = vadd.f32 %v760_v54, %v759_v51  ;;  %v762_v57 = vpop.f32.mrb[6].mxu0 }
 0x101   :  { %v789_v52 = vadd.f32 %v788_v50, %v787_v49  ;;  %v790_v53 = vpop.f32.mrb[6].mxu1  ;;  %v763_v59 = vpop.f32.mrb[7].mxu0 }
 0x102   :  { %v791_v55 = vpop.f32.mrb[7].mxu1  ;;  %v764_v60 = vadd.f32 %v763_v59, %v762_v57 }
 0x103   :  { %v792_v58 = vadd.f32 %v791_v55, %v790_v53  ;;  %v551_v61 = vadd.f32 %v789_v52, %v761_v56 }
 0x105   :  { %v554_v62 = vadd.f32 %v792_v58, %v764_v60 }
 0x116   :  { %v821_v63 = vpop.f32.mrb[8].mxu0 }
 0x117   :  { %v600_v0 = vadd.f32 %v821_v63, %v551_v61  ;;  %v591_v1 = vpop.f32.mrb[9].mxu0 }
 0x118   :  { %v592_v2 = vadd.f32 %v591_v1, %v543_v47  ;;  %v822_v3 = vpop.f32.mrb[10].mxu0 }
 0x119   :  { %v608_v4 = vmul.f32 0.01, %v600_v0  ;;  %v603_v5 = vadd.f32 %v822_v3, %v554_v62  ;;  %v594_v6 = vpop.f32.mrb[11].mxu0 }
 0x11a   :  { %v606_v7 = vmul.f32 0.01, %v592_v2  ;;  %v595_v8 = vadd.f32 %v594_v6, %v546_v48 }
 0x11b   :  { %v609_v9 = vmul.f32 0.01, %v603_v5  ;;  %v612_v12 = vmax.f32 %v600_v0, %v608_v4 }
 0x11c   :  { %v610_v10 = vmax.f32 %v592_v2, %v606_v7  ;;  %v607_v11 = vmul.f32 0.01, %v595_v8 }
 0x11d   :  { %v613_v13 = vmax.f32 %v603_v5, %v609_v9  ;;  %v645_v20 = vmul.f32 %v612_v12, %v612_v12 }
 0x11e   :  { %v611_v14 = vmax.f32 %v595_v8, %v607_v11  ;;  %v643_v16 = vmul.f32 %v610_v10, %v610_v10 }
 0x11f   :  { %v733_v15 = vpack.c.bf16 %v613_v13, %v612_v12  ;;  %v646_v23 = vmul.f32 %v613_v13, %v613_v13 }
 0x120   :  { %v728_v17 = vpack.c.bf16 %v611_v14, %v610_v10  ;;  %v634_v18 = vadd.f32 %v611_v14, %v610_v10  ;;  %v644_v19 = vmul.f32 %v611_v14, %v611_v14 }
 0x121   :  { %736 = vst [vmem:[%s1078_s4 + $0x8] sm:$0xff] %v733_v15  }
 0x122   :  { %729 = vst [vmem:[%s1078_s4] sm:$0xff] %v728_v17   ;;  %v635_v21 = vadd.f32 %v634_v18, %v612_v12  ;;  %v647_v22 = vadd.f32 %v644_v19, %v643_v16 }
 0x124   :  { %v636_v24 = vadd.f32 %v635_v21, %v613_v13  ;;  %v648_v25 = vadd.f32 %v647_v22, %v645_v20 }
 0x126   :  { %v637_v26 = vrot.slane %v636_v24, 4  ;;  %v649_v27 = vadd.f32 %v648_v25, %v646_v23 }
 0x128   :  { %v638_v28 = vadd.f32 %v637_v26, %v636_v24  ;;  %v650_v29 = vrot.slane %v649_v27, 4 }
 0x12a   :  { %v639_v30 = vrot.slane %v638_v28, 2  ;;  %v651_v31 = vadd.f32 %v650_v29, %v649_v27 }
 0x12c   :  { %v640_v32 = vadd.f32 %v639_v30, %v638_v28  ;;  %v652_v33 = vrot.slane %v651_v31, 2 }
 0x12e   :  { %v641_v34 = vrot.slane %v640_v32, 1  ;;  %v653_v35 = vadd.f32 %v652_v33, %v651_v31 }
 0x130   :  { %v654_v36 = vrot.slane %v653_v35, 1  ;;  %v642_v37 = vadd.f32 %v641_v34, %v640_v32 }
 0x132   :  { %v655_v38 = vadd.f32 %v654_v36, %v653_v35 }
 0x134   :  { %v657_v39 = vsel %vm62_vm1, %v642_v37, %v655_v38 }
 0x135   :  { %658 = vst [vmem:[%s1079_s5] sm:$0x3] %v657_v39 }

// kernel: double_conv.5
= control target key start
LH: loop header
LB: loop body
LE: loop exit
PB: predicated region body
PF: predicated region fallthrough
CT: control target
= control target key end

     0   :  { %s107_s0 = inlined_call_operand.vmem [shape: bf16[2,16,128], index: 0, kind: input, shape index: {}]   ;;  %s108_s1 = inlined_call_operand.vmem [shape: f32[1,128], index: 1, kind: input, shape index: {}]   ;;  %s109_s2 = inlined_call_operand.vmem [shape: f32[1,128], index: 2, kind: input, shape index: {}]   ;;  %s110_s3 = inlined_call_operand.vmem [shape: f32[2,16,128], index: 3, kind: output, shape index: {}]  }
   0x1   :  { %v55_v0 = vld [vmem:[%s107_s0] sm:$0xff]   ;;  %v62_v4 = vld [vmem:[%s107_s0 + $0x8] sm:$0xff]  }
   0x2   :  { %v52_v1 = vld [vmem:[%s108_s1] ss:$0 sm:$0xff]  ;;  %v56_v2 = vunpack.c.l.bf16 %v55_v0  ;;  %v57_v3 = vunpack.c.h.bf16 %v55_v0  ;;  %v60_v6 = vunpack.c.l.bf16 %v62_v4  ;;  %v61_v7 = vunpack.c.h.bf16 %v62_v4 }
   0x3   :  { %v53_v5 = vld [vmem:[%s109_s2] ss:$0 sm:$0xff] }
   0x4   :  { %v29_v8 = vmul.f32 %v56_v2, %v52_v1  ;;  %v30_v9 = vmul.f32 %v57_v3, %v52_v1  ;;  %v31_v10 = vmul.f32 %v60_v6, %v52_v1  ;;  %v32_v11 = vmul.f32 %v61_v7, %v52_v1 }
   0x6   :  { %v40_v12 = vadd.f32 %v53_v5, %v29_v8  ;;  %v41_v13 = vadd.f32 %v53_v5, %v30_v9  ;;  %v42_v14 = vadd.f32 %v53_v5, %v31_v10  ;;  %v43_v15 = vadd.f32 %v53_v5, %v32_v11 }
   0x8   :  { %44 = vst [vmem:[%s110_s3] sm:$0xff] %v40_v12  ;;  %45 = vst [vmem:[%s110_s3 + $0x8] sm:$0xff] %v41_v13 }
   0x9   :  { %46 = vst [vmem:[%s110_s3 + $0x10] sm:$0xff] %v42_v14  ;;  %47 = vst [vmem:[%s110_s3 + $0x18] sm:$0xff] %v43_v15 }

</bundles_post_ra>
